<compile_context>
chip_gen: v7x
topology: tpu7x:2x2x1
jax: 0.10.0
libtpu: 0.0.40
codegen_flags: <defaults>
</compile_context>

<pallas_src>
import jax
import jax.numpy as jnp
from jax.experimental import pallas as pl
from jax.experimental.pallas import tpu as pltpu


_NEG_PAD = -1e30  # bias for padded vocab columns: exp(s_pad - m) underflows to 0


def _round_up(x, m):
    return (x + m - 1) // m * m


def _pick_tile(padded_dim, target):
    """Largest multiple of 128 <= target that divides padded_dim (padded_dim % 128 == 0)."""
    t = max(128, min(padded_dim, (target // 128) * 128))
    while padded_dim % t:
        t -= 128
    return t


def _vmem_limit_bytes():
    """Generation-aware scoped-VMEM limit: ~96 MiB on v5e/v6e (128 MiB/TC),
    48 MiB on v7x (64 MiB/TC); conservative 48 MiB if the query fails."""
    cap = 64 << 20
    try:
        cap = int(getattr(pltpu.get_tpu_info(), "vmem_capacity_bytes", cap))
    except Exception:
        pass
    return max(32 << 20, min(cap * 3 // 4, 100 << 20))


# --------------------------------------------------------------------------- #
# Kernels
# --------------------------------------------------------------------------- #
def _encode_kernel(x_ref, w1_ref, b1_ref, w2_ref, b2_ref, w3_ref, b3_ref, eps_ref,
                   mu_ref, logvar_ref, z_ref, acc_ref):
    k = pl.program_id(0)                      # fc1 vocab-reduction step (OUTER: W1 streamed once)
    i = pl.program_id(1)                      # batch tile (INNER: selects accumulator slot)

    # partial fc1: x[i-tile, k-tile] @ W1[k-tile, :] accumulated in f32 per batch tile.
    partial = jnp.dot(x_ref[...].astype(w1_ref.dtype), w1_ref[...],
                      preferred_element_type=jnp.float32)

    @pl.when(k == 0)
    def _():
        acc_ref[i] = partial

    @pl.when(k > 0)
    def _():
        acc_ref[i] = acc_ref[i] + partial

    @pl.when(k == pl.num_programs(0) - 1)
    def _():
        lp = mu_ref.shape[1]
        h1 = jnp.maximum(acc_ref[i] + b1_ref[...], 0.0)                         # relu(fc1)
        h2 = jnp.dot(h1.astype(w2_ref.dtype), w2_ref[...],
                     preferred_element_type=jnp.float32) + b2_ref[...]
        h2 = jnp.maximum(h2, 0.0)                                               # relu(fc2)
        # dropout with the module default p=0.0 is the identity.
        # TODO(synk): stochastic dropout (pltpu.prng_*) for dropoutProb > 0.
        h3 = h2.astype(w3_ref.dtype)
        # fused fc31|fc32: one wide MXU pass sharing the h3 load, split below.
        t = jnp.dot(h3, w3_ref[...], preferred_element_type=jnp.float32) + b3_ref[...]
        mu = t[:, :lp]
        logvar = 1.0 / (1.0 + jnp.exp(-t[:, lp:]))                              # sigmoid(fc32)
        z = eps_ref[...] * jnp.exp(0.5 * logvar) + mu                           # eps*sqrt(exp(lv))+mu
        mu_ref[...] = mu
        logvar_ref[...] = logvar
        z_ref[...] = z.astype(z_ref.dtype)


def _decode_lse_kernel(z_ref, w41_ref, b41_ref, w41n_ref, b41n_ref,
                       lse1_ref, lse2_ref, m1_ref, l1_ref, m2_ref, l2_ref):
    j = pl.program_id(0)                      # vocab output tile (OUTER: W41/W41n streamed once)
    i = pl.program_id(1)                      # batch tile (INNER: selects stats slot)

    z = z_ref[...]
    s1 = jnp.dot(z, w41_ref[...], preferred_element_type=jnp.float32) + b41_ref[...]
    s2 = jnp.dot(z, w41n_ref[...], preferred_element_type=jnp.float32) + b41n_ref[...]

    @pl.when(j == 0)
    def _():
        neg = jnp.full(m1_ref.shape[1:], -jnp.inf, jnp.float32)
        zero = jnp.zeros(l1_ref.shape[1:], jnp.float32)
        m1_ref[i] = neg
        l1_ref[i] = zero
        m2_ref[i] = neg
        l2_ref[i] = zero

    # online logsumexp accumulation over vocab tiles (per batch tile slot i)
    m1 = m1_ref[i]
    m1n = jnp.maximum(m1, jnp.max(s1, axis=1, keepdims=True))
    l1_ref[i] = l1_ref[i] * jnp.exp(m1 - m1n) + jnp.sum(jnp.exp(s1 - m1n), axis=1, keepdims=True)
    m1_ref[i] = m1n

    m2 = m2_ref[i]
    m2n = jnp.maximum(m2, jnp.max(s2, axis=1, keepdims=True))
    l2_ref[i] = l2_ref[i] * jnp.exp(m2 - m2n) + jnp.sum(jnp.exp(s2 - m2n), axis=1, keepdims=True)
    m2_ref[i] = m2n

    @pl.when(j == pl.num_programs(0) - 1)
    def _():
        lse1_ref[...] = m1_ref[i] + jnp.log(l1_ref[i])
        lse2_ref[...] = m2_ref[i] + jnp.log(l2_ref[i])


def _decode_out_kernel(z_ref, w41_ref, b41_ref, w41n_ref, b41n_ref, lse1_ref, lse2_ref,
                       prob_ref, nn_prob_ref):
    # Output pass: recompute the scores for this vocab tile and subtract the
    # precomputed logsumexp; each lane-dense output block is written exactly once.
    z = z_ref[...]
    s1 = jnp.dot(z, w41_ref[...], preferred_element_type=jnp.float32) + b41_ref[...]
    s2 = jnp.dot(z, w41n_ref[...], preferred_element_type=jnp.float32) + b41n_ref[...]
    prob_ref[...] = (s1 - lse1_ref[...]).astype(prob_ref.dtype)
    nn_prob_ref[...] = (s2 - lse2_ref[...]).astype(nn_prob_ref.dtype)


# --------------------------------------------------------------------------- #
# Wrapper
# --------------------------------------------------------------------------- #
def pack_params(params, *, compute_dtype=jnp.bfloat16):
    """One-time packing: pad every dim to a multiple of 128 (MXU / lane tiles),
    fuse fc31|fc32 into one [Hp, 2*Lp] weight, cast matmul weights to bf16
    (f32 accumulation happens inside the kernels).  Padded vocab columns of the
    decoder biases get a huge negative value so they never contribute to the
    softmax normalizer."""
    w1 = params["w1"]
    V, H = w1.shape
    L = params["w31"].shape[1]
    Vp, Hp, Lp = _round_up(V, 128), _round_up(H, 128), _round_up(L, 128)

    def pad_w(w, r, c):
        return jnp.pad(w.astype(jnp.float32), ((0, r - w.shape[0]), (0, c - w.shape[1])))

    def pad_b(b, c, val=0.0):
        return jnp.pad(b.astype(jnp.float32), ((0, 0), (0, c - b.shape[1])),
                       constant_values=val)

    w3 = jnp.concatenate([pad_w(params["w31"], Hp, Lp), pad_w(params["w32"], Hp, Lp)], axis=1)
    b3 = jnp.concatenate([pad_b(params["b31"], Lp), pad_b(params["b32"], Lp)], axis=1)

    return {
        "w1": pad_w(params["w1"], Vp, Hp).astype(compute_dtype),
        "b1": pad_b(params["b1"], Hp),
        "w2": pad_w(params["w2"], Hp, Hp).astype(compute_dtype),
        "b2": pad_b(params["b2"], Hp),
        "w3": w3.astype(compute_dtype),
        "b3": b3,
        "w41": pad_w(params["w41"], Lp, Vp).astype(compute_dtype),
        "b41": pad_b(params["b41"], Vp, _NEG_PAD),
        "w41n": pad_w(params["w41n"], Lp, Vp).astype(compute_dtype),
        "b41n": pad_b(params["b41n"], Vp, _NEG_PAD),
    }


def nbrreg_forward(x, eps, packed, *, tile_b=None, tile_vi=None, tile_vo=None,
                   out_dtype=jnp.float32):
    """x: [B, V] (f32 or bf16), eps: [B, L] float32, packed: output of pack_params.
    out_dtype: dtype of the two [B, V] log-prob outputs (bf16 halves decode HBM writes)."""
    B, V = x.shape
    L = eps.shape[1]
    Vp, Hp = packed["w1"].shape
    Lp = packed["w41"].shape[0]
    dt = packed["w1"].dtype

    vmem_limit = _vmem_limit_bytes()
    big_vmem = vmem_limit >= (80 << 20)          # v5e/v6e-class budget

    if tile_b is None:
        tile_b = min(256, _round_up(B, 8))       # 256 matches the 256-wide MXU on v6e/v7x
    tile_b = max(8, _round_up(tile_b, 8))
    Bp = _round_up(B, tile_b)
    if tile_vi is None:
        tile_vi = 4096 if big_vmem else 2048
    if tile_vo is None:
        tile_vo = 4096 if big_vmem else 2048
    tvi = _pick_tile(Vp, tile_vi)                # fc1 contraction tile
    tvo = _pick_tile(Vp, tile_vo)                # decoder output tile (lane-dense, x128)

    nb, nvi, nvo = Bp // tile_b, Vp // tvi, Vp // tvo

    # Pad only when shapes are unaligned; the bf16 cast of x happens inside the
    # encode kernel, so no padded [B, V] bf16 copy is ever materialized.
    xp = x if (B == Bp and V == Vp) else jnp.pad(x, ((0, Bp - B), (0, Vp - V)))
    eps = eps.astype(jnp.float32)
    epsp = eps if (B == Bp and L == Lp) else jnp.pad(eps, ((0, Bp - B), (0, Lp - L)))

    # TODO(synk): chunk the batch at the wrapper level if the resident fc1
    # accumulator (Bp*Hp*4 bytes) outgrows the VMEM budget (batches beyond ~8k rows).

    # ---------------- encode: fc1 (vocab-reduction OUTER, batch INNER -> W1 streamed once),
    # then fc2 and fused fc31|fc32 + reparametrization at the last reduction step.
    mu_p, logvar_p, z_p = pl.pallas_call(
        _encode_kernel,
        out_shape=(
            jax.ShapeDtypeStruct((Bp, Lp), jnp.float32),   # mu
            jax.ShapeDtypeStruct((Bp, Lp), jnp.float32),   # logvar
            jax.ShapeDtypeStruct((Bp, Lp), dt),            # z (bf16 for the decode MXU)
        ),
        grid_spec=pltpu.PrefetchScalarGridSpec(
            num_scalar_prefetch=0,
            grid=(nvi, nb),
            in_specs=[
                pl.BlockSpec((tile_b, tvi), lambda k, i: (i, k)),    # x (cast in-kernel)
                pl.BlockSpec((tvi, Hp),     lambda k, i: (k, 0)),    # W1 (streamed exactly once)
                pl.BlockSpec((1, Hp),       lambda k, i: (0, 0)),    # b1
                pl.BlockSpec((Hp, Hp),      lambda k, i: (0, 0)),    # W2 (resident)
                pl.BlockSpec((1, Hp),       lambda k, i: (0, 0)),    # b2
                pl.BlockSpec((Hp, 2 * Lp),  lambda k, i: (0, 0)),    # W31|W32 fused
                pl.BlockSpec((1, 2 * Lp),   lambda k, i: (0, 0)),    # b31|b32 fused
                pl.BlockSpec((tile_b, Lp),  lambda k, i: (i, 0)),    # eps
            ],
            out_specs=[
                pl.BlockSpec((tile_b, Lp), lambda k, i: (i, 0)),
                pl.BlockSpec((tile_b, Lp), lambda k, i: (i, 0)),
                pl.BlockSpec((tile_b, Lp), lambda k, i: (i, 0)),
            ],
            # per-batch-tile f32 fc1 accumulators, all resident across the W1 stream
            scratch_shapes=[pltpu.VMEM((nb, tile_b, Hp), jnp.float32)],
        ),
        compiler_params=pltpu.CompilerParams(
            # k carries the accumulator; batch is kept "arbitrary" (non-leading
            # parallel avoided for portability; this kernel is HBM-bound anyway).
            dimension_semantics=("arbitrary", "arbitrary"),
            vmem_limit_bytes=vmem_limit,
        ),
    )(xp, packed["w1"], packed["b1"], packed["w2"], packed["b2"],
      packed["w3"], packed["b3"], epsp)

    # ---------------- decode pass 1: online logsumexp stats (vocab OUTER -> weights streamed once)
    lse1, lse2 = pl.pallas_call(
        _decode_lse_kernel,
        out_shape=(
            jax.ShapeDtypeStruct((Bp, 1), jnp.float32),
            jax.ShapeDtypeStruct((Bp, 1), jnp.float32),
        ),
        grid_spec=pltpu.PrefetchScalarGridSpec(
            num_scalar_prefetch=0,
            grid=(nvo, nb),
            in_specs=[
                pl.BlockSpec((tile_b, Lp), lambda j, i: (i, 0)),   # z
                pl.BlockSpec((Lp, tvo),    lambda j, i: (0, j)),   # W41 (streamed once)
                pl.BlockSpec((1, tvo),     lambda j, i: (0, j)),   # b41
                pl.BlockSpec((Lp, tvo),    lambda j, i: (0, j)),   # W41n (streamed once)
                pl.BlockSpec((1, tvo),     lambda j, i: (0, j)),   # b41n
            ],
            out_specs=[
                pl.BlockSpec((tile_b, 1), lambda j, i: (i, 0)),
                pl.BlockSpec((tile_b, 1), lambda j, i: (i, 0)),
            ],
            scratch_shapes=[pltpu.VMEM((nb, tile_b, 1), jnp.float32)] * 4,  # m1, l1, m2, l2
        ),
        compiler_params=pltpu.CompilerParams(
            dimension_semantics=("arbitrary", "arbitrary"),
            vmem_limit_bytes=vmem_limit,
        ),
    )(z_p, packed["w41"], packed["b41"], packed["w41n"], packed["b41n"])

    # ---------------- decode pass 2: write log-probs (every block written exactly once,
    # no carried state -> both grid axes fully parallel / megacore-shardable).
    prob_p, nn_prob_p = pl.pallas_call(
        _decode_out_kernel,
        out_shape=(
            jax.ShapeDtypeStruct((Bp, Vp), out_dtype),
            jax.ShapeDtypeStruct((Bp, Vp), out_dtype),
        ),
        grid_spec=pltpu.PrefetchScalarGridSpec(
            num_scalar_prefetch=0,
            grid=(nvo, nb),
            in_specs=[
                pl.BlockSpec((tile_b, Lp), lambda j, i: (i, 0)),   # z
                pl.BlockSpec((Lp, tvo),    lambda j, i: (0, j)),   # W41 (streamed once)
                pl.BlockSpec((1, tvo),     lambda j, i: (0, j)),   # b41
                pl.BlockSpec((Lp, tvo),    lambda j, i: (0, j)),   # W41n (streamed once)
                pl.BlockSpec((1, tvo),     lambda j, i: (0, j)),   # b41n
                pl.BlockSpec((tile_b, 1),  lambda j, i: (i, 0)),   # lse1
                pl.BlockSpec((tile_b, 1),  lambda j, i: (i, 0)),   # lse2
            ],
            out_specs=[
                pl.BlockSpec((tile_b, tvo), lambda j, i: (i, j)),
                pl.BlockSpec((tile_b, tvo), lambda j, i: (i, j)),
            ],
        ),
        compiler_params=pltpu.CompilerParams(
            dimension_semantics=("parallel", "parallel"),
            vmem_limit_bytes=vmem_limit,
        ),
    )(z_p, packed["w41"], packed["b41"], packed["w41n"], packed["b41n"], lse1, lse2)

    # Skip the output copy when no padding was needed (common case: aligned B/V).
    if B == Bp and V == Vp:
        prob_w, nn_prob_w = prob_p, nn_prob_p
    else:
        prob_w, nn_prob_w = prob_p[:B, :V], nn_prob_p[:B, :V]
    if B == Bp and L == Lp:
        mu, logvar = mu_p, logvar_p
    else:
        mu, logvar = mu_p[:B, :L], logvar_p[:B, :L]
    return prob_w, nn_prob_w, mu, logvar


# --------------------------------------------------------------------------- #
# Init / reference / demo
# --------------------------------------------------------------------------- #
def init_params(key, vocab_size, latent_dim, hidden_dim):
    """nn.Linear-style init U(-1/sqrt(fan_in), 1/sqrt(fan_in)); weights stored [in, out]."""
    def linear(k, fan_in, fan_out):
        kw, kb = jax.random.split(k)
        bound = 1.0 / (fan_in ** 0.5)
        w = jax.random.uniform(kw, (fan_in, fan_out), jnp.float32, -bound, bound)
        b = jax.random.uniform(kb, (1, fan_out), jnp.float32, -bound, bound)
        return w, b

    keys = jax.random.split(key, 6)
    p = {}
    p["w1"], p["b1"] = linear(keys[0], vocab_size, hidden_dim)
    p["w2"], p["b2"] = linear(keys[1], hidden_dim, hidden_dim)
    p["w31"], p["b31"] = linear(keys[2], hidden_dim, latent_dim)
    p["w32"], p["b32"] = linear(keys[3], hidden_dim, latent_dim)
    p["w41"], p["b41"] = linear(keys[4], latent_dim, vocab_size)
    p["w41n"], p["b41n"] = linear(keys[5], latent_dim, vocab_size)
    return p


def reference_forward(x, eps, params, *, compute_dtype=jnp.bfloat16):
    """Pure-JAX reference with the same mixed-precision policy as the kernels
    (bf16 matmul operands, f32 accumulation)."""
    f32 = jnp.float32

    def mm(a, w):
        return jnp.dot(a.astype(compute_dtype), w.astype(compute_dtype),
                       preferred_element_type=f32)

    h1 = jnp.maximum(mm(x, params["w1"]) + params["b1"], 0.0)
    h2 = jnp.maximum(mm(h1, params["w2"]) + params["b2"], 0.0)
    mu = mm(h2, params["w31"]) + params["b31"]
    logvar = 1.0 / (1.0 + jnp.exp(-(mm(h2, params["w32"]) + params["b32"])))
    z = eps * jnp.exp(0.5 * logvar) + mu
    s1 = mm(z, params["w41"]) + params["b41"]
    s2 = mm(z, params["w41n"]) + params["b41n"]
    return (jax.nn.log_softmax(s1, axis=1), jax.nn.log_softmax(s2, axis=1), mu, logvar)


if __name__ == "__main__":
    # Small, module-consistent shapes (documents are [batch, vocabSize]).
    BATCH = 32
    VOCAB = 512       # vocabSize (dataset-dependent in the original)
    LATENT = 32       # latentDim (padded to 128 internally)
    HIDDEN = 128      # module hardcodes 1000; kept small for the demo

    key = jax.random.PRNGKey(0)
    k_x, k_eps, k_p = jax.random.split(key, 3)

    x = jax.random.uniform(k_x, (BATCH, VOCAB), jnp.float32)      # bag-of-words style docs
    eps = jax.random.normal(k_eps, (BATCH, LATENT), jnp.float32)  # reparam noise (explicit input)
    params = init_params(k_p, VOCAB, LATENT, HIDDEN)

    packed = pack_params(params)
    # Small tiles so the demo exercises the multi-tile paths: the fc1 vocab-
    # reduction grid, the per-batch-tile accumulator slots, and the two-pass
    # (stats + output) decode vocab grid.
    prob_w, nn_prob_w, mu, logvar = jax.block_until_ready(
        nbrreg_forward(x, eps, packed, tile_b=16, tile_vi=128, tile_vo=128)
    )

    ref = reference_forward(x, eps, params)
    for name, got, want in zip(("prob_w", "nn_prob_w", "mu", "logvar"),
                               (prob_w, nn_prob_w, mu, logvar), ref):
        assert got.shape == want.shape and got.dtype == want.dtype, (name, got.shape, got.dtype)
        err = float(jnp.max(jnp.abs(got - want)))
        assert err < 2e-2, (name, err)

    print("KERNEL_OK")
</pallas_src>

<mosaic_0001>
module attributes {stable_mosaic.version = 11 : i64} {
  func.func @_encode_kernel(%arg0: i32, %arg1: i32, %arg2: memref<16x128xf32, #tpu.memory_space<vmem>>, %arg3: memref<128x128xbf16, #tpu.memory_space<vmem>>, %arg4: memref<1x128xf32, #tpu.memory_space<vmem>>, %arg5: memref<128x128xbf16, #tpu.memory_space<vmem>>, %arg6: memref<1x128xf32, #tpu.memory_space<vmem>>, %arg7: memref<128x256xbf16, #tpu.memory_space<vmem>>, %arg8: memref<1x256xf32, #tpu.memory_space<vmem>>, %arg9: memref<16x128xf32, #tpu.memory_space<vmem>>, %arg10: memref<16x128xf32, #tpu.memory_space<vmem>>, %arg11: memref<16x128xf32, #tpu.memory_space<vmem>>, %arg12: memref<16x128xbf16, #tpu.memory_space<vmem>>, %arg13: memref<2x16x128xf32, #tpu.memory_space<vmem>>) attributes {dimension_semantics = [#tpu.dimension_semantics<arbitrary>, #tpu.dimension_semantics<arbitrary>], iteration_bounds = array<i64: 4, 2>, scalar_prefetch = 0 : i64, scratch_operands = 1 : i64, tpu.core_type = #tpu.core_type<tc>, window_params = [{transform_indices = @transform_0, window_bounds = array<i64: 16, 128>}, {transform_indices = @transform_1, window_bounds = array<i64: 128, 128>}, {pipeline_mode = #tpu.pipeline_mode<synchronous>, transform_indices = @transform_2, window_bounds = array<i64: 1, 128>}, {pipeline_mode = #tpu.pipeline_mode<synchronous>, transform_indices = @transform_3, window_bounds = array<i64: 128, 128>}, {pipeline_mode = #tpu.pipeline_mode<synchronous>, transform_indices = @transform_4, window_bounds = array<i64: 1, 128>}, {pipeline_mode = #tpu.pipeline_mode<synchronous>, transform_indices = @transform_5, window_bounds = array<i64: 128, 256>}, {pipeline_mode = #tpu.pipeline_mode<synchronous>, transform_indices = @transform_6, window_bounds = array<i64: 1, 256>}, {transform_indices = @transform_7, window_bounds = array<i64: 16, 128>}, {transform_indices = @transform_8, window_bounds = array<i64: 16, 128>}, {transform_indices = @transform_9, window_bounds = array<i64: 16, 128>}, {transform_indices = @transform_10, window_bounds = array<i64: 16, 128>}]} {
    %c0 = arith.constant 0 : index
    %c0_0 = arith.constant 0 : index
    %0 = vector.load %arg2[%c0, %c0_0] : memref<16x128xf32, #tpu.memory_space<vmem>>, vector<16x128xf32>
    %1 = arith.truncf %0 : vector<16x128xf32> to vector<16x128xbf16>
    %c0_1 = arith.constant 0 : index
    %c0_2 = arith.constant 0 : index
    %2 = vector.load %arg3[%c0_1, %c0_2] : memref<128x128xbf16, #tpu.memory_space<vmem>>, vector<128x128xbf16>
    %cst = arith.constant dense<0.000000e+00> : vector<16x128xf32>
    %3 = tpu.matmul %1, %2, %cst {dimension_numbers = #tpu.dot_dimension_numbers<[1], [0], [0], [1], [0, 0, 1, 1], [], []>} : vector<16x128xbf16>, vector<128x128xbf16>, vector<16x128xf32> -> vector<16x128xf32>
    %c0_i32 = arith.constant 0 : i32
    %4 = arith.cmpi eq, %arg0, %c0_i32 : i32
    %5 = arith.extui %4 : i1 to i32
    %c0_i32_3 = arith.constant 0 : i32
    %6 = arith.cmpi ne, %5, %c0_i32_3 : i32
    scf.if %6 {
      %13 = arith.index_cast %arg1 : i32 to index
      %c0_7 = arith.constant 0 : index
      %c0_8 = arith.constant 0 : index
      %14 = vector.load %arg13[%13, %c0_7, %c0_8] : memref<2x16x128xf32, #tpu.memory_space<vmem>>, vector<1x16x128xf32>
      %15 = vector.shape_cast %14 : vector<1x16x128xf32> to vector<16x128xf32>
      %16 = vector.shape_cast %3 : vector<16x128xf32> to vector<1x16x128xf32>
      tpu.vector_store %arg13[%13, %c0_7, %c0_8], %16 {strides = array<i32>} : memref<2x16x128xf32, #tpu.memory_space<vmem>>, vector<1x16x128xf32>,
    } else {
    }
    %c0_i32_4 = arith.constant 0 : i32
    %7 = arith.cmpi sgt, %arg0, %c0_i32_4 : i32
    %8 = arith.extui %7 : i1 to i32
    %c0_i32_5 = arith.constant 0 : i32
    %9 = arith.cmpi ne, %8, %c0_i32_5 : i32
    scf.if %9 {
      %13 = arith.index_cast %arg1 : i32 to index
      %c0_7 = arith.constant 0 : index
      %c0_8 = arith.constant 0 : index
      %14 = vector.load %arg13[%13, %c0_7, %c0_8] : memref<2x16x128xf32, #tpu.memory_space<vmem>>, vector<1x16x128xf32>
      %15 = vector.shape_cast %14 : vector<1x16x128xf32> to vector<16x128xf32>
      %16 = arith.addf %15, %3 : vector<16x128xf32>
      %17 = arith.index_cast %arg1 : i32 to index
      %c0_9 = arith.constant 0 : index
      %c0_10 = arith.constant 0 : index
      %18 = vector.load %arg13[%17, %c0_9, %c0_10] : memref<2x16x128xf32, #tpu.memory_space<vmem>>, vector<1x16x128xf32>
      %19 = vector.shape_cast %18 : vector<1x16x128xf32> to vector<16x128xf32>
      %20 = vector.shape_cast %16 : vector<16x128xf32> to vector<1x16x128xf32>
      tpu.vector_store %arg13[%17, %c0_9, %c0_10], %20 {strides = array<i32>} : memref<2x16x128xf32, #tpu.memory_space<vmem>>, vector<1x16x128xf32>,
    } else {
    }
    %c3_i32 = arith.constant 3 : i32
    %10 = arith.cmpi eq, %arg0, %c3_i32 : i32
    %11 = arith.extui %10 : i1 to i32
    %c0_i32_6 = arith.constant 0 : i32
    %12 = arith.cmpi ne, %11, %c0_i32_6 : i32
    scf.if %12 {
      %13 = arith.index_cast %arg1 : i32 to index
      %c0_7 = arith.constant 0 : index
      %c0_8 = arith.constant 0 : index
      %14 = vector.load %arg13[%13, %c0_7, %c0_8] : memref<2x16x128xf32, #tpu.memory_space<vmem>>, vector<1x16x128xf32>
      %15 = vector.shape_cast %14 : vector<1x16x128xf32> to vector<16x128xf32>
      %c0_9 = arith.constant 0 : index
      %c0_10 = arith.constant 0 : index
      %16 = vector.load %arg4[%c0_9, %c0_10] : memref<1x128xf32, #tpu.memory_space<vmem>>, vector<1x128xf32>
      %17 = vector.broadcast %16 : vector<1x128xf32> to vector<16x128xf32>
      %18 = arith.addf %15, %17 : vector<16x128xf32>
      %cst_11 = arith.constant 0.000000e+00 : f32
      %19 = vector.broadcast %cst_11 : f32 to vector<16x128xf32>
      %20 = arith.maximumf %18, %19 : vector<16x128xf32>
      %21 = arith.truncf %20 : vector<16x128xf32> to vector<16x128xbf16>
      %c0_12 = arith.constant 0 : index
      %c0_13 = arith.constant 0 : index
      %22 = vector.load %arg5[%c0_12, %c0_13] : memref<128x128xbf16, #tpu.memory_space<vmem>>, vector<128x128xbf16>
      %cst_14 = arith.constant dense<0.000000e+00> : vector<16x128xf32>
      %23 = tpu.matmul %21, %22, %cst_14 {dimension_numbers = #tpu.dot_dimension_numbers<[1], [0], [0], [1], [0, 0, 1, 1], [], []>} : vector<16x128xbf16>, vector<128x128xbf16>, vector<16x128xf32> -> vector<16x128xf32>
      %c0_15 = arith.constant 0 : index
      %c0_16 = arith.constant 0 : index
      %24 = vector.load %arg6[%c0_15, %c0_16] : memref<1x128xf32, #tpu.memory_space<vmem>>, vector<1x128xf32>
      %25 = vector.broadcast %24 : vector<1x128xf32> to vector<16x128xf32>
      %26 = arith.addf %23, %25 : vector<16x128xf32>
      %cst_17 = arith.constant 0.000000e+00 : f32
      %27 = vector.broadcast %cst_17 : f32 to vector<16x128xf32>
      %28 = arith.maximumf %26, %27 : vector<16x128xf32>
      %29 = arith.truncf %28 : vector<16x128xf32> to vector<16x128xbf16>
      %c0_18 = arith.constant 0 : index
      %c0_19 = arith.constant 0 : index
      %30 = vector.load %arg7[%c0_18, %c0_19] : memref<128x256xbf16, #tpu.memory_space<vmem>>, vector<128x256xbf16>
      %cst_20 = arith.constant dense<0.000000e+00> : vector<16x256xf32>
      %31 = tpu.matmul %29, %30, %cst_20 {dimension_numbers = #tpu.dot_dimension_numbers<[1], [0], [0], [1], [0, 0, 1, 1], [], []>} : vector<16x128xbf16>, vector<128x256xbf16>, vector<16x256xf32> -> vector<16x256xf32>
      %c0_21 = arith.constant 0 : index
      %c0_22 = arith.constant 0 : index
      %32 = vector.load %arg8[%c0_21, %c0_22] : memref<1x256xf32, #tpu.memory_space<vmem>>, vector<1x256xf32>
      %33 = vector.broadcast %32 : vector<1x256xf32> to vector<16x256xf32>
      %34 = arith.addf %31, %33 : vector<16x256xf32>
      %35 = vector.extract_strided_slice %34 {offsets = [0, 0], sizes = [16, 128], strides = [1, 1]} : vector<16x256xf32> to vector<16x128xf32>
      %36 = vector.extract_strided_slice %34 {offsets = [0, 128], sizes = [16, 128], strides = [1, 1]} : vector<16x256xf32> to vector<16x128xf32>
      %cst_23 = arith.constant 0.000000e+00 : f32
      %37 = vector.broadcast %cst_23 : f32 to vector<16x128xf32>
      %38 = arith.subf %37, %36 : vector<16x128xf32>
      %39 = math.exp %38 : vector<16x128xf32>
      %cst_24 = arith.constant 1.000000e+00 : f32
      %40 = vector.broadcast %cst_24 : f32 to vector<16x128xf32>
      %41 = arith.addf %40, %39 : vector<16x128xf32>
      %cst_25 = arith.constant 1.000000e+00 : f32
      %42 = vector.broadcast %cst_25 : f32 to vector<16x128xf32>
      %43 = arith.divf %42, %41 : vector<16x128xf32>
      %c0_26 = arith.constant 0 : index
      %c0_27 = arith.constant 0 : index
      %44 = vector.load %arg9[%c0_26, %c0_27] : memref<16x128xf32, #tpu.memory_space<vmem>>, vector<16x128xf32>
      %cst_28 = arith.constant 5.000000e-01 : f32
      %45 = vector.broadcast %cst_28 : f32 to vector<16x128xf32>
      %46 = arith.mulf %45, %43 : vector<16x128xf32>
      %47 = math.exp %46 : vector<16x128xf32>
      %48 = arith.mulf %44, %47 : vector<16x128xf32>
      %49 = arith.addf %48, %35 : vector<16x128xf32>
      %c0_29 = arith.constant 0 : index
      %c0_30 = arith.constant 0 : index
      %50 = vector.load %arg10[%c0_29, %c0_30] : memref<16x128xf32, #tpu.memory_space<vmem>>, vector<16x128xf32>
      tpu.vector_store %arg10[%c0_29, %c0_30], %35 {strides = array<i32>} : memref<16x128xf32, #tpu.memory_space<vmem>>, vector<16x128xf32>,
      %c0_31 = arith.constant 0 : index
      %c0_32 = arith.constant 0 : index
      %51 = vector.load %arg11[%c0_31, %c0_32] : memref<16x128xf32, #tpu.memory_space<vmem>>, vector<16x128xf32>
      tpu.vector_store %arg11[%c0_31, %c0_32], %43 {strides = array<i32>} : memref<16x128xf32, #tpu.memory_space<vmem>>, vector<16x128xf32>,
      %52 = arith.truncf %49 : vector<16x128xf32> to vector<16x128xbf16>
      %c0_33 = arith.constant 0 : index
      %c0_34 = arith.constant 0 : index
      %53 = vector.load %arg12[%c0_33, %c0_34] : memref<16x128xbf16, #tpu.memory_space<vmem>>, vector<16x128xbf16>
      tpu.vector_store %arg12[%c0_33, %c0_34], %52 {strides = array<i32>} : memref<16x128xbf16, #tpu.memory_space<vmem>>, vector<16x128xbf16>,
    } else {
    }
    return
  }
  func.func @transform_0(%arg0: i32, %arg1: i32) -> (i32, i32) {
    %c0_i32 = arith.constant 0 : i32
    return %arg1, %arg0 : i32, i32
  }
  func.func @transform_1(%arg0: i32, %arg1: i32) -> (i32, i32) {
    %c0_i32 = arith.constant 0 : i32
    %c0_i32_0 = arith.constant 0 : i32
    return %arg0, %c0_i32 : i32, i32
  }
  func.func @transform_2(%arg0: i32, %arg1: i32) -> (i32, i32) {
    %c0_i32 = arith.constant 0 : i32
    %c0_i32_0 = arith.constant 0 : i32
    %c0_i32_1 = arith.constant 0 : i32
    return %c0_i32, %c0_i32_0 : i32, i32
  }
  func.func @transform_3(%arg0: i32, %arg1: i32) -> (i32, i32) {
    %c0_i32 = arith.constant 0 : i32
    %c0_i32_0 = arith.constant 0 : i32
    %c0_i32_1 = arith.constant 0 : i32
    return %c0_i32, %c0_i32_0 : i32, i32
  }
  func.func @transform_4(%arg0: i32, %arg1: i32) -> (i32, i32) {
    %c0_i32 = arith.constant 0 : i32
    %c0_i32_0 = arith.constant 0 : i32
    %c0_i32_1 = arith.constant 0 : i32
    return %c0_i32, %c0_i32_0 : i32, i32
  }
  func.func @transform_5(%arg0: i32, %arg1: i32) -> (i32, i32) {
    %c0_i32 = arith.constant 0 : i32
    %c0_i32_0 = arith.constant 0 : i32
    %c0_i32_1 = arith.constant 0 : i32
    return %c0_i32, %c0_i32_0 : i32, i32
  }
  func.func @transform_6(%arg0: i32, %arg1: i32) -> (i32, i32) {
    %c0_i32 = arith.constant 0 : i32
    %c0_i32_0 = arith.constant 0 : i32
    %c0_i32_1 = arith.constant 0 : i32
    return %c0_i32, %c0_i32_0 : i32, i32
  }
  func.func @transform_7(%arg0: i32, %arg1: i32) -> (i32, i32) {
    %c0_i32 = arith.constant 0 : i32
    %c0_i32_0 = arith.constant 0 : i32
    return %arg1, %c0_i32 : i32, i32
  }
  func.func @transform_8(%arg0: i32, %arg1: i32) -> (i32, i32) {
    %c0_i32 = arith.constant 0 : i32
    %c0_i32_0 = arith.constant 0 : i32
    return %arg1, %c0_i32 : i32, i32
  }
  func.func @transform_9(%arg0: i32, %arg1: i32) -> (i32, i32) {
    %c0_i32 = arith.constant 0 : i32
    %c0_i32_0 = arith.constant 0 : i32
    return %arg1, %c0_i32 : i32, i32
  }
  func.func @transform_10(%arg0: i32, %arg1: i32) -> (i32, i32) {
    %c0_i32 = arith.constant 0 : i32
    %c0_i32_0 = arith.constant 0 : i32
    return %arg1, %c0_i32 : i32, i32
  }
}

</mosaic_0001>

<bundles_post_ra>
// kernel: tpu_custom_call.1
= control target key start
LH: loop header
LB: loop body
LE: loop exit
PB: predicated region body
PF: predicated region fallthrough
CT: control target
= control target key end

     0   :  { %s2707_s0 = inlined_call_operand.hbm [shape: f32[32,512], index: 0, kind: input, shape index: {}]   ;;  %s2708_s1 = inlined_call_operand.hbm [shape: bf16[512,128], index: 1, kind: input, shape index: {}]   ;;  %s2709_s2 = inlined_call_operand.vmem [shape: f32[1,128], index: 2, kind: input, shape index: {}]   ;;  %s2710_s3 = inlined_call_operand.hbm [shape: bf16[128,128], index: 3, kind: input, shape index: {}]   ;;  %s2711_s4 = inlined_call_operand.vmem [shape: f32[1,128], index: 4, kind: input, shape index: {}]   ;;  %s2712_s5 = inlined_call_operand.hbm [shape: bf16[128,256], index: 5, kind: input, shape index: {}]   ;;  %s2713_s6 = inlined_call_operand.vmem [shape: f32[1,256], index: 6, kind: input, shape index: {}]   ;;  %s2714_s7 = inlined_call_operand.hbm [shape: f32[32,128], index: 7, kind: input, shape index: {}]   ;;  %s2715_s8 = inlined_call_operand.hbm [shape: f32[32,128], index: 8, kind: output, shape index: {0}]   ;;  %s2716_s9 = inlined_call_operand.hbm [shape: f32[32,128], index: 9, kind: output, shape index: {1}]   ;;  %s2717_s10 = inlined_call_operand.hbm [shape: bf16[32,128], index: 10, kind: output, shape index: {2}]  }
   0x1   :  { %2748 = sst [smem:[#allocation33_spill]] %s2707_s0 }
   0x2   :  { %2749 = sst [smem:[#allocation34_spill]] %s2708_s1 }
   0x3   :  { %2750 = sst [smem:[#allocation35_spill]] %s2709_s2 }
   0x4   :  { %2751 = sst [smem:[#allocation36_spill]] %s2710_s3 }
   0x5   :  { %2752 = sst [smem:[#allocation37_spill]] %s2711_s4 }
   0x6   :  { %2753 = sst [smem:[#allocation38_spill]] %s2712_s5 }
   0x7   :  { %2754 = sst [smem:[#allocation39_spill]] %s2713_s6 }
   0x8   :  { %2755 = sst [smem:[#allocation40_spill]] %s2714_s7 }
   0x9   :  { %2756 = sst [smem:[#allocation41_spill]] %s2715_s8 }
   0xa   :  { %2757 = sst [smem:[#allocation42_spill]] %s2716_s9 }
   0xb   :  { %2758 = sst [smem:[#allocation43_spill]] %s2717_s10 }
   0xc   :  { %16 = vsyncpa [#allocation4], 0 }
   0xd   :  { %18 = vsyncpa [#allocation4 + $0x1], 0 }
   0xe   :  { %19 = vsyncpa [#allocation7], 0 }
   0xf   :  { %21 = vsyncpa [#allocation7 + $0x1], 0 }
  0x10   :  { %22 = vsyncpa [#allocation10], 0 }
  0x11   :  { %23 = vsyncpa [#allocation5], 0 }
  0x12   :  { %25 = vsyncpa [#allocation5 + $0x1], 0 }
  0x13   :  { %26 = vsyncpa [#allocation14], 0 }
  0x14   :  { %28 = vsyncpa [#allocation14 + $0x1], 0  ;;  %s2077_s13 = smov 0   ;;  %s2079_s14 = smov 0  }
  0x15   :  { %s2081_s15 = smov 0   ;;  %s2083_s16 = smov 0  }
  0x16   :  { %s2085_s17 = smov 0   ;;  %s2087_s18 = smov 0  }
  0x17   :  { %s2089_s19 = smov 0   ;;  %s2091_s20 = smov 0  }
  0x18   :  { %s2093_s21 = smov 0   ;;  %s2095_s22 = smov 0  }
  0x19   :  { %s2097_s23 = smov 0   ;;  %s2099_s24 = smov 0  }
  0x1a   :  { %s2101_s25 = smov 0   ;;  %s2103_s26 = smov 0  }
  0x1b LB: > { %2759 = sst [smem:[#allocation23_spill]] %s1946_s13  ;;  %s2148_s27 = sadd.s32 4294967295, %s1998_s26   ;;  %s1998_s26 = sphi %s2103_s26, %s34_s26   ;;  %s1994_s25 = sphi %s2101_s25, %s2839_s25   ;;  %s1990_s24 = sphi %s2099_s24, %s2838_s24   ;;  %s1986_s23 = sphi %s2097_s23, %s2837_s23   ;;  %s1982_s22 = sphi %s2095_s22, %s2836_s22   ;;  %s1978_s21 = sphi %s2093_s21, %s2848_s21   ;;  %s1974_s20 = sphi %s2091_s20, %s2847_s20   ;;  %s1970_s19 = sphi %s2089_s19, %s2846_s19   ;;  %s1966_s18 = sphi %s2087_s18, %s2845_s18   ;;  %s1962_s17 = sphi %s2085_s17, %s2844_s17   ;;  %s1958_s16 = sphi %s2083_s16, %s2843_s16   ;;  %s1954_s15 = sphi %s2081_s15, %s2842_s15   ;;  %s1950_s14 = sphi %s2079_s14, %s2841_s14   ;;  %s1946_s13 = sphi %s2077_s13, %s2840_s13  }
  0x1c   : > { %2760 = sst [smem:[#allocation24_spill]] %s1974_s20  ;;  %p1250_p0 = scmp.ge.s32.totalorder %s1998_s26, 1 }
  0x1d   : > { %2761 = sst [smem:[#allocation25_spill]] %s1982_s22  ;;  %p2721_p1 = scmp.eq.s32.totalorder %s2148_s27, 0 }
  0x1e   : > { %2762 = sst [smem:[#allocation26_spill]] %s1986_s23  ;;  %p314_p3 = scmp.lt.s32.totalorder %s1998_s26, 9 }
  0x1f   : > { %2763 = sst [smem:[#allocation27_spill]] %s1990_s24  ;;  %s2000_s29 = smov [#allocation8]  }
  0x20   : > { %2764 = sst [smem:[#allocation28_spill]] %s1994_s25  ;;  %p2154_p4 = pnand %p1250_p0, %p314_p3 }
  0x21   : > { %s329_s30 = sshll.u32 %s2000_s29, 4  ;;  %s2768_s3 = sld [smem:[#allocation36_spill]]  ;;  %s330_s30 = int_to_ptr.vmem [resolvable:$true] %s329_s30 }
  0x22   : > { %s2765_s28 = scalar_select %p2154_p4, 1, 0 }
  0x23   : > { %p1417_p5 = pneg %p2154_p4 }
  0x24   : > { %2766 = sst [smem:[#allocation29_spill]] %s2765_s28 }
  0x25   : > { %p2162_p6 = pnand %p1417_p5, %p2721_p1 }
  0x27   : > { %s1630_s8 = scalar_lea.hbm %s2768_s3, 1024  ;;  %p2735_p8 = pneg %p2162_p6 }
  0x28   : > { %p1631_p7 = scmp.ne.s32.totalorder %s2768_s3, %s1630_s8  ;;  %p1637_p11 = scmp.lt.u32.totalorder %s1630_s8, %s2768_s3 }
  0x2a   : > { %p1633_p9 = pnand %p2735_p8, %p1631_p7 }
  0x2c   : > { %p1634_p10 = pneg %p1633_p9 }
  0x2e   : > { %p1639_p12 = pnand %p1637_p11, %p1634_p10 }
  0x30   : > { %1642 = shalt.err (!%p1639_p12)
}
  0x31   : > { %s1643_s10 = scalar_lea.vmem %s330_s30, 1024  ;;  %p1651_p5 = scmp.lt.s32.totalorder %s330_s30, %s330_s30 }
  0x32   : > { %p1644_p13 = scmp.ne.s32.totalorder %s330_s30, %s1643_s10  ;;  %p1652_p2 = scmp.lt.s32.totalorder %s1643_s10, %s1643_s10 }
  0x34   : > { %p1646_p0 = pnand %p1644_p13, %p2735_p8  ;;  %p1653_p1 = por %p1652_p2, %p1651_p5 }
  0x36   : > { %p1647_p3 = pneg %p1646_p0 }
  0x38   : > { %p1654_p4 = pnand %p1653_p1, %p1647_p3 }
  0x3a   : > { %1657 = shalt.err (!%p1654_p4)
}
  0x3b   : > { %s2723_s6 = smov 64   ;;  %s2724_s4 = smov 4  }
  0x3c   : > { %1420 = dma.hbm_to_vmem [thread:$0]  (!%p2162_p6), %s2768_s3, 1024, %s330_s30, [#allocation7], %s2723_s6, %s2723_s6, %s2724_s4  }
  0x3d   : > { %s43_s12 = sadd.s32 1, %s1990_s24  ;;  %s46_s29 = sadd.s32 1, %s1994_s25 }
  0x3e   : > { %p44_p1 = scmp.ge.s32.totalorder %s43_s12, 2  ;;  %s55_s10 = sadd.s32 1, %s1978_s21 }
  0x3f   : > { %p62_p2 = scmp.ne.s32.totalorder %s1978_s21, %s1974_s20  ;;  %p2734_p4 = scmp.eq.s32.totalorder %s1998_s26, 0 }
  0x40   : > { %s2850_s12 = smov (%p44_p1, %s43_s12), 0  ;;  %s2852_s29 = smov (!%p44_p1, %s46_s29), %s1994_s25 }
  0x41   : > { %2769 = sst [smem:[#allocation30_spill]] %s2850_s12  ;;  %s2202_s2 = ssub.s32 %s1990_s24, %s2850_s12 }
  0x42   : > { %p2206_p7 = por %p2734_p4, %p62_p2  ;;  %p48_p9 = scmp.ge.s32.totalorder %s2852_s29, 4 }
  0x43   : > { %p68_p10 = scmp.ne.s32.totalorder %s1974_s20, %s1970_s19  ;;  %p2772_p12 = scmp.eq.s32.totalorder %s2148_s27, 0 }
  0x44   : > { %s2854_s29 = smov (%p48_p9, %s2852_s29), 0  ;;  %p2733_p0 = scmp.lt.s32.totalorder %s1998_s26, 8 }
  0x45   : > { %2771 = sst [smem:[#allocation31_spill]] %s2854_s29  ;;  %p2217_p13 = por %p2772_p12, %p68_p10 }
  0x46   : > { %s2223_s9 = ssub.s32 %s1994_s25, %s2854_s29  ;;  %s2737_s19 = sand.u32 1, %s1998_s26  }
  0x47   : > { %s2773_s8 = scalar_select %p2217_p13, 1, 0 }
  0x48   : > { %s52_s6 = sor.u32 %s2223_s9, %s2202_s2  ;;  %s364_s4 = sand.u32 1, %s1978_s21  }
  0x49   : > { %2774 = sst [smem:[#allocation32_spill]] %s2773_s8  ;;  %p53_p5 = scmp.eq.s32.totalorder %s52_s6, 0 }
  0x4a   : > { %s1254_s12 = sshll.u32 %s364_s4, 4  ;;  %s1326_s22 = sshll.u32 %s1990_s24, 3 }
  0x4b   : > { %s2232_s3 = scalar_select %p53_p5, %s1978_s21, %s55_s10  }
  0x4c   : > { %s372_s23 = sadd.s32 %s1994_s25, %s1326_s22  ;;  %s366_s8 = scalar_lea.vmem [#allocation3], %s1254_s12 }
  0x4d   : > { %s1257_s20 = sshll.u32 %s372_s23, 7  ;;  %s375_s29 = sshll.u32 %s366_s8, 4  ;;  %s2241_s29 = int_to_ptr.vmem [resolvable:$true] %s375_s29 }
  0x4e   : > { %s2775_s0 = sld [smem:[#allocation33_spill]]  ;;  %p2247_p1 = pnand %p2733_p0, %p2206_p7 }
  0x4f   : > { %s2003_s22 = smov [#allocation9]   ;;  %s2255_s7 = scalar_lea.sflag [#allocation4], %s2737_s19 }
  0x50   : > { %s2251_s23 = sshll.u32 %s2003_s22, 4  ;;  %p1660_p9 = pneg %p2247_p1  ;;  %s346_s23 = int_to_ptr.vmem [resolvable:$true] %s2251_s23 }
  0x54   : > { %s2239_s13 = scalar_lea.hbm %s2775_s0, %s1257_s20  ;;  %s1663_s12 = scalar_lea.hbm %s2775_s0, 2048 }
  0x55   : > { %s1658_s20 = scalar_lea.hbm %s2239_s13, 256  ;;  %p1664_p7 = scmp.lt.u32.totalorder %s2239_s13, %s2775_s0 }
  0x56   : > { %p1659_p2 = scmp.ne.s32.totalorder %s2239_s13, %s1658_s20  ;;  %p1665_p5 = scmp.lt.u32.totalorder %s1663_s12, %s1658_s20 }
  0x57   : > { %p1667_p0 = scmp.lt.u32.totalorder %s1658_s20, %s2239_s13 }
  0x58   : > { %p1661_p10 = pnand %p1660_p9, %p1659_p2  ;;  %p1666_p11 = por %p1665_p5, %p1664_p7 }
  0x5a   : > { %p1662_p12 = pneg %p1661_p10  ;;  %p1668_p4 = por %p1667_p0, %p1666_p11 }
  0x5c   : > { %p1669_p3 = pnand %p1668_p4, %p1662_p12 }
  0x5e   : > { %1672 = shalt.err (!%p1669_p3)
}
  0x5f   : > { %s1673_s8 = scalar_lea.vmem %s2241_s29, 256  ;;  %s2004_s22 = smov [#allocation3]  }
  0x60   : > { %p1674_p2 = scmp.ne.s32.totalorder %s2241_s29, %s1673_s8  ;;  %s1678_s28 = sshll.u32 %s2004_s22, 4  ;;  %s1679_s28 = int_to_ptr.vmem [resolvable:$false] %s1678_s28 }
  0x61   : > { %s1680_s4 = scalar_lea.vmem %s1679_s28, 512  ;;  %p1681_p13 = scmp.lt.s32.totalorder %s2241_s29, %s1679_s28 }
  0x62   : > { %p1676_p10 = pnand %p1674_p2, %p1660_p9  ;;  %p1682_p7 = scmp.lt.s32.totalorder %s1680_s4, %s1673_s8 }
  0x64   : > { %p1677_p8 = pneg %p1676_p10  ;;  %p1683_p5 = por %p1682_p7, %p1681_p13 }
  0x66   : > { %p1684_p11 = pnand %p1683_p5, %p1677_p8 }
  0x68   : > { %1687 = shalt.err (!%p1684_p11)
}
  0x69   : > { %s2005_s20 = smov 512   ;;  %s2739_s12 = smov 128  }
  0x6a   : > { %s2007_s10 = smov 8   ;;  %s2777_s5 = sld [smem:[#allocation38_spill]] }
  0x6b   : > { %1427 = dma.hbm_to_vmem [thread:$0]  (!%p2247_p1), %s2239_s13, 256, %s2241_s29, %s2255_s7, %s2005_s20, %s2739_s12, %s2007_s10  }
  0x6c   : > { %p2778_p4 = pneg %p2162_p6 }
  0x70   : > { %s1688_s8 = scalar_lea.hbm %s2777_s5, 2048 }
  0x71   : > { %p1689_p8 = scmp.ne.s32.totalorder %s2777_s5, %s1688_s8  ;;  %p1695_p3 = scmp.lt.u32.totalorder %s1688_s8, %s2777_s5 }
  0x73   : > { %p1691_p13 = pnand %p1689_p8, %p2778_p4 }
  0x75   : > { %p1692_p0 = pneg %p1691_p13 }
  0x77   : > { %p1697_p9 = pnand %p1695_p3, %p1692_p0 }
  0x79   : > { %1700 = shalt.err (!%p1697_p9)
}
  0x7a   : > { %s1701_s13 = scalar_lea.vmem %s346_s23, 2048  ;;  %p2779_p12 = pmov %p2778_p4 }
  0x7b   : > { %p1702_p1 = scmp.ne.s32.totalorder %s346_s23, %s1701_s13  ;;  %p1709_p7 = scmp.lt.s32.totalorder %s346_s23, %s346_s23 }
  0x7c   : > { %p1710_p5 = scmp.lt.s32.totalorder %s1701_s13, %s1701_s13 }
  0x7d   : > { %p1704_p2 = pnand %p1702_p1, %p2779_p12 }
  0x7e   : > { %p1711_p11 = por %p1710_p5, %p1709_p7 }
  0x7f   : > { %p1705_p10 = pneg %p1704_p2 }
  0x81   : > { %p1712_p4 = pnand %p1711_p11, %p1705_p10 }
  0x83   : > { %1715 = shalt.err (!%p1712_p4)
}
  0x84   : > { %1423 = dma.hbm_to_vmem [thread:$0]  (!%p2162_p6), %s2777_s5, 2048, %s346_s23, [#allocation10], %s2739_s12, %s2739_s12, %s2007_s10  }
  0x85   : > { %s81_s11 = sadd.s32 1, %s1966_s18  ;;  %p88_p8 = scmp.ne.s32.totalorder %s1966_s18, %s1962_s17 }
  0x86   : > { %p2780_p13 = scmp.eq.s32.totalorder %s2223_s9, 0  ;;  %p2781_p0 = scmp.eq.s32.totalorder %s1998_s26, 0 }
  0x87   : > { %p94_p9 = scmp.ne.s32.totalorder %s1962_s17, %s1958_s16  ;;  %s387_s6 = sand.u32 1, %s1966_s18  }
  0x88   : > { %s2315_s19 = scalar_select %p2780_p13, %s1966_s18, %s81_s11  }
  0x89   : > { %p90_p3 = por %p88_p8, %p2781_p0  ;;  %p2782_p1 = scmp.eq.s32.totalorder %s2148_s27, 0 }
  0x8a   : > { %s1258_s30 = sshll.u32 %s387_s6, 6  ;;  %s1327_s22 = sshll.u32 %s1994_s25, 10 }
  0x8b   : > { %p2324_p12 = por %p94_p9, %p2782_p1  ;;  %s2784_s1 = sld [smem:[#allocation34_spill]] }
  0x8c   : > { %s389_s9 = scalar_lea.vmem [#allocation6], %s1258_s30  ;;  %p2785_p6 = scmp.lt.s32.totalorder %s1998_s26, 8 }
  0x8d   : > { %s396_s4 = sshll.u32 %s389_s9, 4  ;;  %s2787_s13 = sand.u32 1, %s1998_s26   ;;  %s2334_s4 = int_to_ptr.vmem [resolvable:$true] %s396_s4 }
  0x8e   : > { %p2338_p2 = pnand %p2785_p6, %p90_p3  ;;  %s2344_s0 = scalar_lea.sflag [#allocation7], %s2787_s13 }
  0x90   : > { %p1718_p7 = pneg %p2338_p2 }
  0x91   : > { %s2332_s23 = scalar_lea.hbm %s2784_s1, %s1327_s22  ;;  %s1721_s30 = scalar_lea.hbm %s2784_s1, 4096 }
  0x92   : > { %s1716_s29 = scalar_lea.hbm %s2332_s23, 1024  ;;  %p1722_p4 = scmp.lt.u32.totalorder %s2332_s23, %s2784_s1 }
  0x93   : > { %p1717_p10 = scmp.ne.s32.totalorder %s2332_s23, %s1716_s29  ;;  %p1723_p8 = scmp.lt.u32.totalorder %s1721_s30, %s1716_s29 }
  0x94   : > { %p1725_p0 = scmp.lt.u32.totalorder %s1716_s29, %s2332_s23 }
  0x95   : > { %p1719_p5 = pnand %p1718_p7, %p1717_p10  ;;  %p1724_p13 = por %p1723_p8, %p1722_p4 }
  0x97   : > { %p1720_p11 = pneg %p1719_p5  ;;  %p1726_p3 = por %p1725_p0, %p1724_p13 }
  0x99   : > { %p1727_p9 = pnand %p1726_p3, %p1720_p11 }
  0x9b   : > { %1730 = shalt.err (!%p1727_p9)
}
  0x9c   : > { %s1731_s28 = scalar_lea.vmem %s2334_s4, 1024  ;;  %s2008_s9 = smov [#allocation6]  }
  0x9d   : > { %p1732_p1 = scmp.ne.s32.totalorder %s2334_s4, %s1731_s28  ;;  %s1736_s13 = sshll.u32 %s2008_s9, 4  ;;  %s1737_s13 = int_to_ptr.vmem [resolvable:$false] %s1736_s13 }
  0x9e   : > { %s1738_s11 = scalar_lea.vmem %s1737_s13, 2048  ;;  %p1739_p5 = scmp.lt.s32.totalorder %s2334_s4, %s1737_s13 }
  0x9f   : > { %p1734_p6 = pnand %p1732_p1, %p1718_p7  ;;  %p1740_p4 = scmp.lt.s32.totalorder %s1738_s11, %s1731_s28 }
  0xa1   : > { %p1735_p10 = pneg %p1734_p6  ;;  %p1741_p8 = por %p1740_p4, %p1739_p5 }
  0xa3   : > { %p1742_p13 = pnand %p1741_p8, %p1735_p10 }
  0xa5   : > { %1745 = shalt.err (!%p1742_p13)
}
  0xa6   : > { %s2788_s29 = smov 4   ;;  %s2789_s6 = smov 64  }
  0xa7   : > { %s2790_s30 = sld [smem:[#allocation23_spill]]  ;;  %s2738_s16 = sadd.s32 4294967294, %s1998_s26  }
  0xa8   : > { %1430 = dma.hbm_to_vmem [thread:$0]  (!%p2338_p2), %s2332_s23, 1024, %s2334_s4, %s2344_s0, %s2789_s6, %s2789_s6, %s2788_s29  }
  0xa9   : > { %s212_s22 = sadd.s32 1, %s1954_s15  ;;  %p219_p7 = scmp.ne.s32.totalorder %s1954_s15, %s1950_s14 }
  0xaa   : > { %p2791_p11 = scmp.eq.s32.totalorder %s2202_s2, 0  ;;  %p2792_p0 = scmp.eq.s32.totalorder %s1998_s26, 0 }
  0xab   : > { %p2794_p1 = scmp.eq.s32.totalorder %s2148_s27, 7  ;;  %p255_p2 = scmp.eq.s32.totalorder %s2738_s16, 7 }
  0xac   : > { %s2382_s8 = scalar_select %p2791_p11, %s1954_s15, %s212_s22  }
  0xad   : > { %p2386_p3 = por %p219_p7, %p2792_p0  ;;  %p225_p9 = scmp.ne.s32.totalorder %s1950_s14, %s2790_s30 }
  0xae   : > { %p2394_p6 = por %p2794_p1, %p219_p7  ;;  %p2796_p10 = scmp.eq.s32.totalorder %s2148_s27, 0 }
  0xaf   : > { %s408_s2 = sand.u32 1, %s1954_s15   ;;  %p2407_p4 = por %p255_p2, %p225_p9 }
  0xb0   : > { %s2795_s9 = scalar_select %p2394_p6, 1, 0 }
  0xb1   : > { %p2402_p5 = por %p225_p9, %p2796_p10  ;;  %s1261_s0 = sshll.u32 %s408_s2, 4 }
  0xb2   : > { %s2798_s4 = scalar_select %p2407_p4, 1, 0 }
  0xb3   : > { %s2797_s23 = scalar_select %p2402_p5, 1, 0 }
  0xb4   : > { %s1328_s13 = sshll.u32 %s1990_s24, 8  ;;  %s2799_s6 = sld [smem:[#allocation40_spill]] }
  0xb5   : > { %s410_s22 = scalar_lea.vmem [#allocation11], %s1261_s0  ;;  %p2800_p8 = scmp.lt.s32.totalorder %s1998_s26, 8 }
  0xb6   : > { %s417_s16 = sshll.u32 %s410_s22, 4  ;;  %s2417_s16 = int_to_ptr.vmem [resolvable:$true] %s417_s16 }
  0xb7   : > { %p2423_p13 = pnand %p2800_p8, %p2386_p3 }
  0xb9   : > { %p1748_p11 = pneg %p2423_p13 }
  0xba   : > { %s2415_s30 = scalar_lea.hbm %s2799_s6, %s1328_s13  ;;  %s1751_s11 = scalar_lea.hbm %s2799_s6, 512 }
  0xbb   : > { %s1746_s2 = scalar_lea.hbm %s2415_s30, 256  ;;  %p1752_p3 = scmp.lt.u32.totalorder %s2415_s30, %s2799_s6 }
  0xbc   : > { %p1747_p7 = scmp.ne.s32.totalorder %s2415_s30, %s1746_s2  ;;  %p1753_p1 = scmp.lt.u32.totalorder %s1751_s11, %s1746_s2 }
  0xbd   : > { %p1755_p10 = scmp.lt.u32.totalorder %s1746_s2, %s2415_s30 }
  0xbe   : > { %p1749_p0 = pnand %p1748_p11, %p1747_p7  ;;  %p1754_p2 = por %p1753_p1, %p1752_p3 }
  0xc0   : > { %p1750_p9 = pneg %p1749_p0  ;;  %p1756_p8 = por %p1755_p10, %p1754_p2 }
  0xc2   : > { %p1757_p4 = pnand %p1756_p8, %p1750_p9 }
  0xc4   : > { %1760 = shalt.err (!%p1757_p4)
}
  0xc5   : > { %s1761_s22 = scalar_lea.vmem %s2417_s16, 256  ;;  %s2009_s0 = smov [#allocation11]  }
  0xc6   : > { %p1762_p7 = scmp.ne.s32.totalorder %s2417_s16, %s1761_s22  ;;  %s1766_s13 = sshll.u32 %s2009_s0, 4  ;;  %s1767_s13 = int_to_ptr.vmem [resolvable:$false] %s1766_s13 }
  0xc7   : > { %s1768_s28 = scalar_lea.vmem %s1767_s13, 512  ;;  %p1769_p5 = scmp.lt.s32.totalorder %s2417_s16, %s1767_s13 }
  0xc8   : > { %p1764_p0 = pnand %p1762_p7, %p1748_p11  ;;  %p1770_p3 = scmp.lt.s32.totalorder %s1768_s28, %s1761_s22 }
  0xca   : > { %p1765_p6 = pneg %p1764_p0  ;;  %p1771_p1 = por %p1770_p3, %p1769_p5 }
  0xcc   : > { %p1772_p2 = pnand %p1771_p1, %p1765_p6 }
  0xce   : > { %1775 = shalt.err (!%p1772_p2)
}
  0xcf   : > { %s2802_s2 = smov 128   ;;  %s2803_s11 = sld [smem:[#allocation29_spill]] }
  0xd0   : > { %1433 = dma.hbm_to_vmem [thread:$0]  (!%p2423_p13), %s2415_s30, 256, %s2417_s16, %s2255_s7, %s2802_s2, %s2802_s2, %s2007_s10  }
  0xd5   : > { %p2804_p4 = scmp.ne.s32.totalorder %s2803_s11, 0 }
  0xd6   : > { %s2805_s29 = sld [smem:[#allocation24_spill]] (!%p2804_p4)  ;;  %s2806_s0 = sld [smem:[#allocation32_spill]] (!%p2804_p4) }
  0xd7   : > { %429 = sbr.rel (%p2804_p4) target bundleno = 1113 (0x459), region = 52  ;;  %s2459_s13 = sand.u32 (!%p2804_p4), 1, %s2148_s27  }
  0xd8   : > { %s432_s12 = scalar_lea.sflag (!%p2804_p4), [#allocation4], %s2459_s13 }
  0xdc   : > { %s433_s22 = sand.u32 (!%p2804_p4), 1, %s2805_s29   ;;  %p2807_p6 = scmp.ne.s32.totalorder (!%p2804_p4), %s2806_s0, 0 }
  0xdd   : > { %s2462_s28 = sshll.u32 (!%p2804_p4), %s433_s22, 4 }
  0xde   : > { %s435_s1 = scalar_lea.vmem [#allocation3], %s2462_s28 }
  0xdf   : > { %1917 = dma.done.wait (%p2807_p6), %s432_s12, 256  }
  0xe0   : > { %1919 = vsyncadd (%p2807_p6), %s432_s12, 4294967040  ;;  %s442_s7 = sand.u32 1, %s1962_s17   ;;  %s441_s16 = scalar_lea.sflag [#allocation7], %s2459_s13 }
  0xe1   : > { %s1266_s10 = sshll.u32 %s442_s7, 6 }
  0xe2   : > { %s2472_s30 = scalar_lea.vmem [#allocation6], %s1266_s10 }
  0xe3   : > { %1921 = dma.done.wait (%p2324_p12), %s441_s16, 1024  }
  0xe4   : > { %1923 = vsyncadd (%p2324_p12), %s441_s16, 4294966272  ;;  %p2808_p5 = scmp.eq.s32.totalorder %s2148_s27, 0 }
  0xe6   : > { %1925 = dma.done.wait (%p2808_p5), [#allocation7], 1024   ;;  %p2809_p13 = pmov %p2808_p5 }
  0xe7   : > { %p2810_p11 = pmov %p2808_p5 }
  0xe8   : > { %1927 = vsyncadd (%p2809_p13), [#allocation7], 4294966272 }
  0xe9   : > { %1929 = dma.done.wait (%p2810_p11), [#allocation10], 2048   ;;  %p2811_p9 = pmov %p2808_p5 }
  0xea   : > { %s2487_s2 = sand.u32 1, %s1950_s14   ;;  %p2812_p12 = scmp.ne.s32.totalorder %s2797_s23, 0 }
  0xeb   : > { %1931 = vsyncadd (%p2811_p9), [#allocation10], 4294965248  ;;  %s2490_s11 = sshll.u32 %s2487_s2, 4 }
  0xec   : > { %s461_s20 = scalar_lea.vmem [#allocation11], %s2490_s11 }
  0xed   : > { %1933 = dma.done.wait (%p2812_p12), %s432_s12, 256  }
  0xee   : > { %1935 = vsyncadd (%p2812_p12), %s432_s12, 4294967040  ;;  %s1272_s27 = sshll.u32 %s2487_s2, 3  ;;  %v2010_v0 = vmov 0.0   ;;  %vm2011_vm0 = vmmov 0   ;;  %v1578_v1 = vld [vmem:[%s2472_s30] sm:$0xff]   ;;  %v1579_v2 = vld [vmem:[%s2472_s30 + $0x8] sm:$0xff]  }
  0xef   : > { %1357 = vmatprep.subr.bf16.mxu0 %v2010_v0  ;;  %1373 = vmatprep.mubr.msk.bf16.mxu0 %vm2011_vm0, %v2010_v0  ;;  %v1580_v3 = vld [vmem:[%s2472_s30 + $0x10] sm:$0xff]   ;;  %v1581_v4 = vld [vmem:[%s2472_s30 + $0x18] sm:$0xff]   ;;  %v1582_v5 = vld [vmem:[%s2472_s30 + $0x20] sm:$0xff]   ;;  %s2511_s23 = scalar_lea.vmem [#allocation12], %s2490_s11  ;;  %s2514_s29 = scalar_lea.vmem [#allocation13], %s2490_s11 }
  0xf0   : > { %1358 = vmatpush3.bf16.msra.mxu0 %v1578_v1  ;;  %v1583_v6 = vld [vmem:[%s2472_s30 + $0x28] sm:$0xff]   ;;  %v1584_v7 = vld [vmem:[%s2472_s30 + $0x30] sm:$0xff]   ;;  %v1585_v8 = vld [vmem:[%s2472_s30 + $0x38] sm:$0xff]   ;;  %s2518_s0 = scalar_lea.vmem [#allocation15], %s1272_s27  ;;  %s2813_s22 = sld [smem:[#allocation26_spill]] }
  0xf1   : > { %1359 = vmatprep.subr.bf16.mxu0 %v2010_v0  ;;  %v525_v9 = vld [vmem:[%s435_s1] sm:$0xff]  ;;  %v526_v10 = vld [vmem:[%s435_s1 + $0x8] sm:$0xff] }
  0xf2   : > { %v527_v11 = vpack.c.bf16 %v526_v10, %v525_v9 }
  0xf4   : > { %1360 = vmatpush3.bf16.msra.mxu0 %v1579_v2 }
  0xf5   : > { %1361 = vmatprep.subr.bf16.mxu0 %v2010_v0 }
  0xf6   : > { %p1281_p10 = scmp.ne.s32.totalorder %s2813_s22, 0 }
  0xf7   : > { %s2814_s28 = sld [smem:[#allocation25_spill]] (!%p1281_p10) }
  0xf8   : > { %1362 = vmatpush3.bf16.msra.mxu0 %v1580_v3 }
  0xf9   : > { %1363 = vmatprep.subr.bf16.mxu0 %v2010_v0 }
  0xfc   : > { %1364 = vmatpush3.bf16.msra.mxu0 %v1581_v4 }
  0xfd   : > { %1365 = vmatprep.subr.bf16.mxu0 %v2010_v0  ;;  %s1282_s1 = sshll.u32 (!%p1281_p10), %s2814_s28, 4 }
  0xfe   : > { %s638_s12 = scalar_lea.vmem (!%p1281_p10), [#allocation2], %s1282_s1 }
 0x100   : > { %1366 = vmatpush3.bf16.msra.mxu0 %v1582_v5 }
 0x101   : > { %1367 = vmatprep.subr.bf16.mxu0 %v2010_v0 }
 0x104   : > { %1368 = vmatpush3.bf16.msra.mxu0 %v1583_v6 }
 0x105   : > { %1369 = vmatprep.subr.bf16.mxu0 %v2010_v0 }
 0x108   : > { %1370 = vmatpush3.bf16.msra.mxu0 %v1584_v7 }
 0x109   : > { %1371 = vmatprep.subr.bf16.mxu0 %v2010_v0 }
 0x10c   : > { %1372 = vmatpush3.bf16.msra.mxu0 %v1585_v8 }
 0x10f   : > { %1374 = vmatmul.mubr.bf16.vlgmr.msra.gmra.mrb[0].mxu0 %v527_v11 }
 0x1df   : > { %636 = sbr.rel (%p1281_p10) target bundleno = 486 (0x1e6), region = 76 }
 0x1e2   : > { %v626_v12 = vpop.f32.mrb[0].mxu0 }
 0x1e3   : > { %v1375_v13 = vpop.f32.mrb[1].mxu0  ;;  %639 = vst [vmem:[%s638_s12] sm:$0xff] (!%p1281_p10), %v626_v12 }
 0x1e4   : > { %v629_v14 = vpop.f32.mrb[2].mxu0 }
 0x1e5   : > { %v1376_v15 = vpop.f32.mrb[3].mxu0  ;;  %640 = vst [vmem:[%s638_s12 + $0x8] sm:$0xff] (!%p1281_p10), %v629_v14 }
 0x1e6 PF: > { %s2815_s7 = sld [smem:[#allocation26_spill]] }
 0x1ec   : > { %p1283_p8 = scmp.le.s32.totalorder %s2815_s7, 0 }
 0x1ed   : > { %s2816_s10 = sld [smem:[#allocation25_spill]] (!%p1283_p8) }
 0x1ee   : > { %644 = sbr.rel (%p1283_p8) target bundleno = 505 (0x1f9), region = 80 }
 0x1f3   : > { %s1284_s16 = sshll.u32 (!%p1283_p8), %s2816_s10, 4 }
 0x1f4   : > { %s646_s30 = scalar_lea.vmem (!%p1283_p8), [#allocation2], %s1284_s16 }
 0x1f5   : > { %v647_v16 = vld [vmem:[%s646_s30] sm:$0xff]  ;;  %v648_v17 = vld [vmem:[%s646_s30 + $0x8] sm:$0xff] }
 0x1f6   : > { %v649_v18 = vadd.f32 %v647_v16, %v626_v12  ;;  %v650_v19 = vadd.f32 %v648_v17, %v629_v14 }
 0x1f8   : > { %651 = vst [vmem:[%s646_s30] sm:$0xff] %v649_v18  ;;  %652 = vst [vmem:[%s646_s30 + $0x8] sm:$0xff] %v650_v19 }
 0x1f9 PF: > { %s2817_s27 = sld [smem:[#allocation26_spill]] }
 0x1ff   : > { %p1285_p7 = scmp.ne.s32.totalorder %s2817_s27, 3 }
 0x200   : > { %v1586_v20 = vld [vmem:[#allocation8] sm:$0xff] (!%p1285_p7)   ;;  %s2818_s22 = sld [smem:[#allocation25_spill]] (!%p1285_p7)  ;;  %v2012_v21 = vmov (!%p1285_p7), 0.0   ;;  %v1587_v22 = vld [vmem:[#allocation8 + $0x8] sm:$0xff] (!%p1285_p7)   ;;  %vm2013_vm1 = vmmov (!%p1285_p7), 0   ;;  %v1588_v23 = vld [vmem:[#allocation8 + $0x10] sm:$0xff] (!%p1285_p7)   ;;  %v806_v0 = vlaneseq (!%p1285_p7) }
 0x201   : > { %656 = sbr.rel (%p1285_p7) target bundleno = 1032 (0x408), region = 84  ;;  %1377 = vmatprep.subr.bf16.mxu0 (!%p1285_p7), %v2012_v21  ;;  %1393 = vmatprep.mubr.msk.bf16.mxu0 (!%p1285_p7), %vm2013_vm1, %v2012_v21  ;;  %v1589_v24 = vld [vmem:[#allocation8 + $0x18] sm:$0xff] (!%p1285_p7)   ;;  %v1594_v25 = vld [vmem:[#allocation9 + $0x4] ss:$8 sps:$4 sm:$0xff] (!%p1285_p7)   ;;  %v1596_v26 = vld [vmem:[#allocation9] ss:$8 sps:$4 sm:$0xff] (!%p1285_p7)  }
 0x202   : > { %1378 = vmatpush3.bf16.msra.mxu0 (!%p1285_p7), %v1586_v20  ;;  %896 = vmatprep.subr.bf16.mxu1 (!%p1285_p7), %v1594_v25  ;;  %v1597_v27 = vld [vmem:[#allocation9 + $0x14] ss:$8 sps:$4 sm:$0xff] (!%p1285_p7)   ;;  %v1599_v28 = vld [vmem:[#allocation9 + $0x10] ss:$8 sps:$4 sm:$0xff] (!%p1285_p7)   ;;  %v1600_v29 = vld [vmem:[#allocation9 + $0x24] ss:$8 sps:$4 sm:$0xff] (!%p1285_p7)  }
 0x203   : > { %1379 = vmatprep.subr.bf16.mxu0 (!%p1285_p7), %v2012_v21  ;;  %897 = vmatpush1.bf16.msra.mxu1 (!%p1285_p7), %v1596_v26  ;;  %v1590_v30 = vld [vmem:[#allocation8 + $0x20] sm:$0xff] (!%p1285_p7)   ;;  %v1591_v31 = vld [vmem:[#allocation8 + $0x28] sm:$0xff] (!%p1285_p7)   ;;  %s2819_s10 = sld [smem:[#allocation35_spill]] (!%p1285_p7)  ;;  %v1603_v36 = vld [vmem:[#allocation9 + $0x34] ss:$8 sps:$4 sm:$0xff] (!%p1285_p7)   ;;  %v2014_v53 = vmov (!%p1285_p7), 0  }
 0x204   : > { %898 = vmatprep.subr.bf16.mxu1 (!%p1285_p7), %v1597_v27  ;;  %v1602_v34 = vld [vmem:[#allocation9 + $0x20] ss:$8 sps:$4 sm:$0xff] (!%p1285_p7)   ;;  %v1605_v37 = vld [vmem:[#allocation9 + $0x30] ss:$8 sps:$4 sm:$0xff] (!%p1285_p7)   ;;  %v1606_v40 = vld [vmem:[#allocation9 + $0x44] ss:$8 sps:$4 sm:$0xff] (!%p1285_p7)   ;;  %928 = vmatprep.mubr.bf16.mxu1 (!%p1285_p7), %v2014_v53 }
 0x205   : > { %v1592_v41 = vld [vmem:[#allocation8 + $0x30] sm:$0xff] (!%p1285_p7)   ;;  %v1608_v42 = vld [vmem:[#allocation9 + $0x40] ss:$8 sps:$4 sm:$0xff] (!%p1285_p7)   ;;  %v1593_v46 = vld [vmem:[#allocation8 + $0x38] sm:$0xff] (!%p1285_p7)   ;;  %s2820_s27 = sld [smem:[#allocation37_spill]] (!%p1285_p7)  ;;  %v807_v1 = vshrl.u32 (!%p1285_p7), %v806_v0, 7 }
 0x206   : > { %1380 = vmatpush3.bf16.msra.mxu0 (!%p1285_p7), %v1587_v22  ;;  %s1286_s28 = sshll.u32 (!%p1285_p7), %s2818_s22, 4  ;;  %v1609_v45 = vld [vmem:[#allocation9 + $0x54] ss:$8 sps:$4 sm:$0xff] (!%p1285_p7)   ;;  %v1611_v47 = vld [vmem:[#allocation9 + $0x50] ss:$8 sps:$4 sm:$0xff] (!%p1285_p7)  }
 0x207   : > { %1381 = vmatprep.subr.bf16.mxu0 (!%p1285_p7), %v2012_v21  ;;  %s658_s1 = scalar_lea.vmem (!%p1285_p7), [#allocation2], %s1286_s28  ;;  %899 = vmatpush1.bf16.msra.mxu1 (!%p1285_p7), %v1599_v28  ;;  %v1612_v49 = vld [vmem:[#allocation9 + $0x64] ss:$8 sps:$4 sm:$0xff] (!%p1285_p7)   ;;  %v1614_v50 = vld [vmem:[#allocation9 + $0x60] ss:$8 sps:$4 sm:$0xff] (!%p1285_p7)   ;;  %v808_v2 = vsub.s32 (!%p1285_p7), 0, %v807_v1 }
 0x208   : > { %v659_v32 = vld [vmem:[%s658_s1] sm:$0xff]  ;;  %v660_v33 = vld [vmem:[%s658_s1 + $0x8] sm:$0xff]  ;;  %900 = vmatprep.subr.bf16.mxu1 %v1600_v29  ;;  %v1615_v51 = vld [vmem:[#allocation9 + $0x74] ss:$8 sps:$4 sm:$0xff]   ;;  %s2821_s1 = sld [smem:[#allocation39_spill]]  ;;  %v812_v4 = vsub.s32 1, %v807_v1 }
 0x209   : > { %v1287_v35 = vld [vmem:[%s2819_s10] ss:$0 sm:$0xff]  ;;  %v1617_v52 = vld [vmem:[#allocation9 + $0x70] ss:$8 sps:$4 sm:$0xff]  }
 0x20a   : > { %1382 = vmatpush3.bf16.msra.mxu0 %v1588_v23  ;;  %v668_v38 = vadd.f32 %v1287_v35, %v659_v32  ;;  %v669_v39 = vadd.f32 %v1287_v35, %v660_v33  ;;  %v951_v29 = vld [vmem:[%s461_s20] sm:$0xff] }
 0x20b   : > { %1383 = vmatprep.subr.bf16.mxu0 %v2012_v21  ;;  %901 = vmatpush1.bf16.msra.mxu1 %v1602_v34  ;;  %v1288_v54 = vld [vmem:[%s2820_s27] ss:$0 sm:$0xff] }
 0x20c   : > { %902 = vmatprep.subr.bf16.mxu1 %v1603_v36  ;;  %v670_v43 = vmax.f32 %v668_v38, 0.0  ;;  %v671_v44 = vmax.f32 %v669_v39, 0.0 }
 0x20e   : > { %1384 = vmatpush3.bf16.msra.mxu0 %v1589_v24  ;;  %v672_v48 = vpack.c.bf16 %v671_v44, %v670_v43  ;;  %v804_v3 = vld [vmem:[%s2821_s1] sm:$0x3] }
 0x20f   : > { %1385 = vmatprep.subr.bf16.mxu0 %v2012_v21  ;;  %903 = vmatpush1.bf16.msra.mxu1 %v1605_v37  ;;  %v809_v5 = vrot.slane %v804_v3, %v808_v2  ;;  %v813_v6 = vrot.slane %v804_v3, %v812_v4 }
 0x210   : > { %904 = vmatprep.subr.bf16.mxu1 %v1606_v40 }
 0x212   : > { %1386 = vmatpush3.bf16.msra.mxu0 %v1590_v30 }
 0x213   : > { %1387 = vmatprep.subr.bf16.mxu0 %v2012_v21  ;;  %905 = vmatpush1.bf16.msra.mxu1 %v1608_v42 }
 0x214   : > { %906 = vmatprep.subr.bf16.mxu1 %v1609_v45 }
 0x216   : > { %1388 = vmatpush3.bf16.msra.mxu0 %v1591_v31  ;;  %v952_v31 = vld [vmem:[%s461_s20 + $0x8] sm:$0xff] }
 0x217   : > { %1389 = vmatprep.subr.bf16.mxu0 %v2012_v21  ;;  %907 = vmatpush1.bf16.msra.mxu1 %v1611_v47 }
 0x218   : > { %908 = vmatprep.subr.bf16.mxu1 %v1612_v49 }
 0x21a   : > { %1390 = vmatpush3.bf16.msra.mxu0 %v1592_v41 }
 0x21b   : > { %1391 = vmatprep.subr.bf16.mxu0 %v2012_v21  ;;  %909 = vmatpush1.bf16.msra.mxu1 %v1614_v50 }
 0x21c   : > { %910 = vmatprep.subr.bf16.mxu1 %v1615_v51 }
 0x21e   : > { %1392 = vmatpush3.bf16.msra.mxu0 %v1593_v46 }
 0x21f   : > { %911 = vmatpush1.bf16.msra.mxu1 %v1617_v52 }
 0x221   : > { %1394 = vmatmul.mubr.bf16.vlgmr.msra.gmra.mrb[0].mxu0 %v672_v48 }
 0x2f4   : > { %v778_v55 = vpop.f32.mrb[0].mxu0 }
 0x2f5   : > { %v779_v56 = vadd.f32 %v1288_v54, %v778_v55  ;;  %v1395_v57 = vpop.f32.mrb[1].mxu0 }
 0x2f6   : > { %v781_v58 = vpop.f32.mrb[2].mxu0 }
 0x2f7   : > { %v782_v59 = vadd.f32 %v1288_v54, %v781_v58  ;;  %v1396_v60 = vpop.f32.mrb[3].mxu0  ;;  %v785_v61 = vmax.f32 %v779_v56, 0.0 }
 0x2f9   : > { %v786_v62 = vmax.f32 %v782_v59, 0.0 }
 0x2fb   : > { %v787_v63 = vpack.c.bf16 %v786_v62, %v785_v61 }
 0x2fd   : > { %929 = vmatmul.mubr.bf16.vlgmr.msra.gmra.mrb[0].mxu1 %v787_v63 }
 0x3d0   : > { %v930_v7 = vpop.f32.mrb[0].mxu1 }
 0x3d1   : > { %v931_v8 = vadd.f32 %v930_v7, %v809_v5  ;;  %v932_v9 = vpop.f32.mrb[1].mxu1 }
 0x3d2   : > { %v933_v10 = vadd.f32 %v932_v9, %v813_v6  ;;  %v934_v11 = vpop.f32.mrb[2].mxu1 }
 0x3d3   : > { %963 = vst [vmem:[%s2511_s23] sm:$0xff] %v931_v8  ;;  %v935_v12 = vadd.f32 %v934_v11, %v809_v5  ;;  %v936_v13 = vpop.f32.mrb[3].mxu1 }
 0x3d4   : > { %v939_v14 = vsub.f32 0.0, %v933_v10  ;;  %v937_v15 = vadd.f32 %v936_v13, %v813_v6 }
 0x3d5   : > { %964 = vst [vmem:[%s2511_s23 + $0x8] sm:$0xff] %v935_v12 }
 0x3d6   : > { %v941_v16 = vmul.f32 1.442695, %v939_v14  ;;  %v940_v17 = vsub.f32 0.0, %v937_v15 }
 0x3d8   : > { %1618 = vpow2.f32 %v941_v16  ;;  %v943_v18 = vmul.f32 1.442695, %v940_v17 }
 0x3da   : > { %1620 = vpow2.f32 %v943_v18 }
 0x3e2   : > { %v1619_v19 = vpop.eup %1618 }
 0x3e3   : > { %v945_v20 = vadd.f32 1.0, %v1619_v19 }
 0x3e4   : > { %v1621_v21 = vpop.eup %1620 }
 0x3e5   : > { %1622 = vrcp.f32 %v945_v20  ;;  %v946_v22 = vadd.f32 1.0, %v1621_v21 }
 0x3e7   : > { %1624 = vrcp.f32 %v946_v22 }
 0x3ef   : > { %v1623_v23 = vpop.eup %1622 }
 0x3f0   : > { %v953_v24 = vmul.f32 0.5, %v1623_v23  ;;  %965 = vst [vmem:[%s2514_s29] sm:$0xff] %v1623_v23 }
 0x3f1   : > { %v1625_v25 = vpop.eup %1624 }
 0x3f2   : > { %v955_v26 = vmul.f32 1.442695, %v953_v24  ;;  %v954_v27 = vmul.f32 0.5, %v1625_v25  ;;  %966 = vst [vmem:[%s2514_s29 + $0x8] sm:$0xff] %v1625_v25 }
 0x3f4   : > { %1626 = vpow2.f32 %v955_v26  ;;  %v957_v28 = vmul.f32 1.442695, %v954_v27 }
 0x3f6   : > { %1628 = vpow2.f32 %v957_v28 }
 0x3fe   : > { %v1627_v30 = vpop.eup %1626 }
 0x3ff   : > { %v959_v32 = vmul.f32 %v1627_v30, %v951_v29 }
 0x400   : > { %v1629_v33 = vpop.eup %1628 }
 0x401   : > { %v961_v34 = vadd.f32 %v959_v32, %v931_v8  ;;  %v960_v35 = vmul.f32 %v1629_v33, %v952_v31 }
 0x403   : > { %v962_v36 = vadd.f32 %v960_v35, %v935_v12 }
 0x405   : > { %v1337_v37 = vpack.c.bf16 %v962_v36, %v961_v34 }
 0x407   : > { %1338 = vst [vmem:[%s2518_s0] sm:$0xff] %v1337_v37  }
 0x408 PF: > { %s2822_s12 = sld [smem:[#allocation25_spill]]  ;;  %s1017_s20 = sshll.u32 %s2514_s29, 4  ;;  %s2553_s20 = int_to_ptr.vmem [resolvable:$true] %s1017_s20 }
 0x409   : > { %s2823_s30 = sld [smem:[#allocation42_spill]]  ;;  %s2747_s27 = scalar_lea.sflag [#allocation14], %s2459_s13 }
 0x40a   : > { %s1776_s22 = scalar_lea.vmem %s2553_s20, 256  ;;  %p2824_p3 = scmp.ne.s32.totalorder %s2795_s9, 0 }
 0x40b   : > { %p1777_p0 = scmp.ne.s32.totalorder %s2553_s20, %s1776_s22  ;;  %s2015_s28 = smov [#allocation13]  }
 0x40c   : > { %s1780_s1 = sshll.u32 %s2015_s28, 4  ;;  %s1781_s1 = int_to_ptr.vmem [resolvable:$false] %s1780_s1 }
 0x40d   : > { %p1778_p1 = pnand %p1777_p0, %p2824_p3  ;;  %s1782_s5 = scalar_lea.vmem %s1781_s1, 512 }
 0x40e   : > { %s2742_s7 = sshll.u32 %s2822_s12, 8  ;;  %p1783_p4 = scmp.lt.s32.totalorder %s2553_s20, %s1781_s1 }
 0x40f   : > { %s2550_s11 = scalar_lea.hbm %s2823_s30, %s2742_s7  ;;  %p1779_p2 = pneg %p1778_p1 }
 0x410   : > { %p1784_p6 = scmp.lt.s32.totalorder %s1782_s5, %s1776_s22 }
 0x412   : > { %p1785_p5 = por %p1784_p6, %p1783_p4 }
 0x414   : > { %p1786_p13 = pnand %p1785_p5, %p1779_p2 }
 0x416   : > { %1789 = shalt.err (!%p1786_p13)
}
 0x417   : > { %s1790_s29 = scalar_lea.hbm %s2550_s11, 256  ;;  %s1794_s28 = scalar_lea.hbm %s2823_s30, 512 }
 0x418   : > { %p1791_p11 = scmp.ne.s32.totalorder %s2550_s11, %s1790_s29  ;;  %p1795_p10 = scmp.lt.u32.totalorder %s2550_s11, %s2823_s30 }
 0x419   : > { %p1796_p8 = scmp.lt.u32.totalorder %s1794_s28, %s1790_s29  ;;  %p1798_p0 = scmp.lt.u32.totalorder %s1790_s29, %s2550_s11 }
 0x41a   : > { %p1792_p9 = pnand %p1791_p11, %p2824_p3 }
 0x41b   : > { %p1797_p7 = por %p1796_p8, %p1795_p10 }
 0x41c   : > { %p1793_p12 = pneg %p1792_p9 }
 0x41d   : > { %p1799_p1 = por %p1798_p0, %p1797_p7 }
 0x41f   : > { %p1800_p2 = pnand %p1799_p1, %p1793_p12 }
 0x421   : > { %1803 = shalt.err (!%p1800_p2)
}
 0x422   : > { %s2016_s5 = smov 128   ;;  %s2017_s22 = smov 8  }
 0x423   : > { %1412 = dma.vmem_to_hbm [thread:$0]  (%p2824_p3), %s2553_s20, 256, %s2550_s11, %s2747_s27, %s2016_s5, %s2016_s5, %s2017_s22  }
 0x424   : > { %s2825_s7 = sshll.u32 %s2822_s12, 8  ;;  %s2826_s16 = sld [smem:[#allocation41_spill]] }
 0x425   : > { %s1001_s6 = sshll.u32 %s2511_s23, 4  ;;  %s1333_s30 = sshll.u32 %s2822_s12, 7  ;;  %s2590_s6 = int_to_ptr.vmem [resolvable:$true] %s1001_s6 }
 0x426   : > { %s978_s25 = scalar_lea.sflag [#allocation5], %s2487_s2  ;;  %s1804_s24 = scalar_lea.vmem %s2590_s6, 256 }
 0x427   : > { %p1805_p4 = scmp.ne.s32.totalorder %s2590_s6, %s1804_s24  ;;  %s2018_s11 = smov [#allocation12]  }
 0x428   : > { %s1808_s20 = sshll.u32 %s2018_s11, 4  ;;  %s1809_s20 = int_to_ptr.vmem [resolvable:$false] %s1808_s20 }
 0x429   : > { %p1806_p6 = pnand %p1805_p4, %p2824_p3  ;;  %s1810_s27 = scalar_lea.vmem %s1809_s20, 512 }
 0x42a   : > { %s2827_s28 = smov %s2826_s16  ;;  %s2587_s1 = scalar_lea.hbm %s2826_s16, %s2825_s7 }
 0x42b   : > { %p1807_p5 = pneg %p1806_p6  ;;  %p1811_p13 = scmp.lt.s32.totalorder %s2590_s6, %s1809_s20 }
 0x42c   : > { %p1812_p11 = scmp.lt.s32.totalorder %s1810_s27, %s1804_s24 }
 0x42e   : > { %p1813_p9 = por %p1812_p11, %p1811_p13 }
 0x430   : > { %p1814_p12 = pnand %p1813_p9, %p1807_p5 }
 0x432   : > { %1817 = shalt.err (!%p1814_p12)
}
 0x433   : > { %s1818_s23 = scalar_lea.hbm %s2587_s1, 256  ;;  %s1822_s10 = scalar_lea.hbm %s2827_s28, 512 }
 0x434   : > { %p1819_p10 = scmp.ne.s32.totalorder %s2587_s1, %s1818_s23  ;;  %p1823_p0 = scmp.lt.u32.totalorder %s2587_s1, %s2827_s28 }
 0x435   : > { %p1824_p1 = scmp.lt.u32.totalorder %s1822_s10, %s1818_s23  ;;  %p1826_p4 = scmp.lt.u32.totalorder %s1818_s23, %s2587_s1 }
 0x436   : > { %p1820_p8 = pnand %p1819_p10, %p2824_p3 }
 0x437   : > { %p1825_p2 = por %p1824_p1, %p1823_p0 }
 0x438   : > { %p1821_p7 = pneg %p1820_p8 }
 0x439   : > { %p1827_p6 = por %p1826_p4, %p1825_p2 }
 0x43b   : > { %p1828_p5 = pnand %p1827_p6, %p1821_p7 }
 0x43d   : > { %1831 = shalt.err (!%p1828_p5)
}
 0x43e   : > { %1411 = dma.vmem_to_hbm [thread:$0]  (%p2824_p3), %s2590_s6, 256, %s2587_s1, %s978_s25, %s2016_s5, %s2016_s5, %s2017_s22  }
 0x43f   : > { %s2828_s20 = sld [smem:[#allocation43_spill]]  ;;  %s1033_s29 = sshll.u32 %s2518_s0, 4  ;;  %s2628_s29 = int_to_ptr.vmem [resolvable:$true] %s1033_s29 }
 0x440   : > { %s1832_s10 = scalar_lea.vmem %s2628_s29, 128  ;;  %s2019_s2 = smov [#allocation15]  }
 0x441   : > { %p1833_p13 = scmp.ne.s32.totalorder %s2628_s29, %s1832_s10  ;;  %s1836_s16 = sshll.u32 %s2019_s2, 4  ;;  %s1837_s16 = int_to_ptr.vmem [resolvable:$false] %s1836_s16 }
 0x442   : > { %s1838_s25 = scalar_lea.vmem %s1837_s16, 256  ;;  %p1839_p12 = scmp.lt.s32.totalorder %s2628_s29, %s1837_s16 }
 0x443   : > { %p1834_p11 = pnand %p1833_p13, %p2824_p3  ;;  %p1840_p10 = scmp.lt.s32.totalorder %s1838_s25, %s1832_s10 }
 0x445   : > { %s2829_s7 = smov %s2828_s20  ;;  %s2625_s23 = scalar_lea.hbm %s2828_s20, %s1333_s30 }
 0x446   : > { %p1835_p9 = pneg %p1834_p11  ;;  %p1841_p8 = por %p1840_p10, %p1839_p12 }
 0x448   : > { %p1842_p7 = pnand %p1841_p8, %p1835_p9 }
 0x44a   : > { %1845 = shalt.err (!%p1842_p7)
}
 0x44b   : > { %s1846_s6 = scalar_lea.hbm %s2625_s23, 128  ;;  %s1850_s30 = scalar_lea.hbm %s2829_s7, 256 }
 0x44c   : > { %p1847_p0 = scmp.ne.s32.totalorder %s2625_s23, %s1846_s6  ;;  %p1851_p4 = scmp.lt.u32.totalorder %s2625_s23, %s2829_s7 }
 0x44d   : > { %p1852_p6 = scmp.lt.u32.totalorder %s1850_s30, %s1846_s6  ;;  %p1854_p13 = scmp.lt.u32.totalorder %s1846_s6, %s2625_s23 }
 0x44e   : > { %p1848_p1 = pnand %p1847_p0, %p2824_p3 }
 0x44f   : > { %p1853_p5 = por %p1852_p6, %p1851_p4 }
 0x450   : > { %p1849_p2 = pneg %p1848_p1 }
 0x451   : > { %p1855_p11 = por %p1854_p13, %p1853_p5 }
 0x453   : > { %p1856_p9 = pnand %p1855_p11, %p1849_p2 }
 0x455   : > { %1859 = shalt.err (!%p1856_p9)
}
 0x456   : > { %s2020_s1 = smov 64   ;;  %s2021_s11 = smov 4  }
 0x457   : > { %s2830_s24 = scalar_lea.sflag [#allocation14], %s2459_s13 }
 0x458   : > { %1413 = dma.vmem_to_hbm [thread:$0]  (%p2824_p3), %s2628_s29, 128, %s2625_s23, %s2830_s24, %s2020_s1, %s2020_s1, %s2021_s11  }
 0x459 PF: > { %s2831_s27 = sld [smem:[#allocation23_spill]]  ;;  %p1449_p12 = scmp.ge.s32.totalorder %s1998_s26, 2 }
 0x45a   : > { %p2832_p10 = scmp.ne.s32.totalorder %s2798_s4, 0 }
 0x45c   : > { %p1435_p8 = pnand %p1449_p12, %p2832_p10 }
 0x45f   : > { %s1048_s20 = sand.u32 1, %s2831_s27  }
 0x460   : > { %s1049_s10 = scalar_lea.sflag [#allocation5], %s1048_s20 }
 0x461   : > { %1937 = dma.done.wait (!%p1435_p8), %s1049_s10, 256  }
 0x462   : > { %1939 = vsyncadd (!%p1435_p8), %s1049_s10, 4294967040  ;;  %s2833_s2 = sadd.s32 4294967294, %s1998_s26  }
 0x463   : > { %s1057_s16 = sand.u32 1, %s2833_s2  }
 0x464   : > { %s1058_s25 = scalar_lea.sflag [#allocation14], %s1057_s16 }
 0x465   : > { %1941 = dma.done.wait (!%p1435_p8), %s1058_s25, 384  }
 0x466   : > { %1943 = vsyncadd (!%p1435_p8), %s1058_s25, 4294966912  ;;  %s34_s26 = sadd.s32 1, %s1998_s26   ;;  %s2835_s4 = sld [smem:[#allocation24_spill]] }
 0x467   : > { %p2660_p3 = scmp.ge.s32.totalorder %s34_s26, 10   ;;  %s2836_s22 = sld [smem:[#allocation27_spill]] }
 0x468   : > { %s2837_s23 = sld [smem:[#allocation28_spill]]  ;;  %s2838_s24 = sld [smem:[#allocation30_spill]] }
 0x469   : > { %s2839_s25 = sld [smem:[#allocation31_spill]]  ;;  %s2840_s13 = smov %s1950_s14 }
 0x46a   : > { %s2841_s14 = smov %s1954_s15  ;;  %s2842_s15 = smov %s2382_s8 }
 0x46b   : > { %s2843_s16 = smov %s1962_s17  ;;  %s2844_s17 = smov %s1966_s18 }
 0x46c   : > { %s2845_s18 = smov %s2315_s19  ;;  %s2846_s19 = smov %s2835_s4 }
 0x46d   : > { %s2847_s20 = smov %s1978_s21  ;;  %s2848_s21 = smov %s2232_s3 }
 0x46e   :  { %33 = sbr.rel (!%p2660_p3) target bundleno = 27 (0x1b), region = 176 }
 0x475   :  { %1072 = vsyncpa [#allocation4], 1 }
 0x476   :  { %1074 = vsyncpa [#allocation4 + $0x1], 1 }
 0x477   :  { %1075 = vsyncpa [#allocation7], 1 }
 0x478   :  { %1077 = vsyncpa [#allocation7 + $0x1], 1 }
 0x479   :  { %1078 = vsyncpa [#allocation10], 1 }
 0x47a   :  { %1079 = vsyncpa [#allocation5], 1 }
 0x47b   :  { %1081 = vsyncpa [#allocation5 + $0x1], 1 }
 0x47c   :  { %1082 = vsyncpa [#allocation14], 1 }
 0x47d   :  { %1084 = vsyncpa [#allocation14 + $0x1], 1 }

</bundles_post_ra>
